<compile_context>
chip_gen: v7x
topology: tpu7x:2x2x1
jax: 0.10.0
libtpu: 0.0.40
codegen_flags: <defaults>
</compile_context>

<pallas_src>
import functools
import math

import numpy as np

import jax
import jax.numpy as jnp
from jax.experimental import pallas as pl
from jax.experimental.pallas import tpu as pltpu


# ------------------------------ Pallas kernel ------------------------------- #

def _interp_kernel(x_ref, ah_ref, bwt_ref, o_ref):
    """x_ref: (bc, H, W); ah_ref: (Ho, H); bwt_ref: (W, Wo); o_ref: (bc, Ho, Wo)."""
    bc, H, W = x_ref.shape
    Ho = ah_ref.shape[0]
    Wo = bwt_ref.shape[1]

    x = x_ref[...]                                    # (bc, H, W) native dtype
    ah = ah_ref[...]                                  # (Ho, H)
    bwt = bwt_ref[...]                                # (W, Wo)

    # H-resample of the whole block as a single batched MXU contraction:
    #   (bc, Ho, H) x (bc, H, W) -> (bc, Ho, W), f32 accumulation.
    ah_b = jnp.broadcast_to(ah[None], (bc, Ho, H))
    t = jax.lax.dot_general(
        ah_b, x,
        dimension_numbers=(((2,), (1,)), ((0,), (0,))),
        preferred_element_type=jnp.float32)           # (bc, Ho, W) f32

    # W-resample as ONE flattened matmul with M = bc*Ho:
    #   (bc*Ho, W) @ (W, Wo) -> (bc*Ho, Wo), f32 accumulation.
    t = t.reshape(bc * Ho, W).astype(bwt.dtype)
    out = jnp.dot(t, bwt, preferred_element_type=jnp.float32)   # (bc*Ho, Wo)

    # TODO(synk): for Wo < 128 the store is lane-masked; a lane-dense (bc, Ho*Wo)
    # output layout would speed up the store path for very small images.
    o_ref[...] = out.reshape(bc, Ho, Wo).astype(o_ref.dtype)


# ------------------------------ Host-side glue ------------------------------ #

def _resample_matrix(n_in, scale, mode):
    """(n_out, n_in) weights matching F.interpolate(..., align_corners=False)."""
    n_out = int(math.floor(n_in * scale))
    m = np.zeros((n_out, n_in), dtype=np.float32)
    if mode == "nearest":
        for o in range(n_out):
            m[o, min(int(math.floor(o * n_in / n_out)), n_in - 1)] = 1.0
    elif mode in ("linear", "bilinear", "trilinear"):
        for o in range(n_out):
            src = (o + 0.5) / scale - 0.5          # half-pixel centers
            src = max(src, 0.0)                    # PyTorch clamps the low side
            i0 = min(int(math.floor(src)), n_in - 1)
            i1 = min(i0 + 1, n_in - 1)
            lam = src - i0
            m[o, i0] += 1.0 - lam
            m[o, i1] += lam
    else:
        # TODO(synk): bicubic / area modes not implemented (just different weights).
        raise NotImplementedError(f"mode={mode!r}")
    # TODO(synk): A_h/B_w are 2-banded; for very large H,W a banded/tiled contraction
    # would cut FLOPs and weight VMEM (matters most on v5e compute roofline).
    return m


def _vmem_capacity_bytes():
    """Physical VMEM of the current TPU generation (64 MiB v7x, 128 MiB v5e/v6e)."""
    try:
        return int(pltpu.get_tpu_info().vmem_capacity_bytes)
    except Exception:
        return 64 << 20   # conservative fallback that fits every generation


def _pick_block(nc, per_img_bytes, fixed_bytes, budget_bytes):
    """Largest image-block size whose full VMEM plan fits the budget."""
    avail = max(budget_bytes - fixed_bytes, per_img_bytes)
    bc = max(1, min(nc, avail // per_img_bytes))
    if nc >= 2:
        # Keep at least 2 grid steps so the "parallel" axis can shard across the
        # two TensorCores on v7x (no-op cost on single-TC v5e/v6e).
        bc = min(bc, -(-nc // 2))
    return int(bc)


@functools.partial(jax.jit, static_argnames=("scale_factor", "mode"))
def interpolate_pallas(x, scale_factor=2.0, mode="bilinear"):
    """Pallas equivalent of F.interpolate(x, scale_factor, mode, align_corners=False).

    x: (N, C, H, W) -> (N, C, H_out, W_out).
    """
    if isinstance(scale_factor, (tuple, list)):
        sh, sw = float(scale_factor[0]), float(scale_factor[1])
    else:
        sh = sw = float(scale_factor)

    if x.ndim != 4:
        # TODO(synk): 3-D ('linear') / 5-D ('trilinear') inputs not supported here.
        raise NotImplementedError("only 4-D (N, C, H, W) inputs are supported")

    if x.dtype not in (jnp.dtype(jnp.float32), jnp.dtype(jnp.bfloat16),
                       jnp.dtype(jnp.float16)):
        x = x.astype(jnp.float32)

    N, C, H, W = x.shape
    ah = _resample_matrix(H, sh, mode)               # (Ho, H)
    bw = _resample_matrix(W, sw, mode)               # (Wo, W)
    Ho, Wo = ah.shape[0], bw.shape[0]

    w_dtype = x.dtype                                # bf16 weights for bf16 inputs (MXU-native)
    ah_j = jnp.asarray(ah, dtype=w_dtype)            # (Ho, H)
    bwt_j = jnp.asarray(bw.T, dtype=w_dtype)         # (W, Wo)

    nc = N * C
    xf = x.reshape(nc, H, W)                         # native dtype, no f32 round trip

    x_bytes = jnp.dtype(x.dtype).itemsize
    w_bytes = jnp.dtype(w_dtype).itemsize

    # Full VMEM accounting for one grid step: double-buffered in/out tiles,
    # resident weight tiles, and the in-kernel f32 intermediates.
    per_img = (2 * H * W * x_bytes                   # input tile (double buffered)
               + 2 * Ho * Wo * x_bytes               # output tile (double buffered)
               + Ho * H * w_bytes                    # broadcast A_h operand
               + Ho * W * 4 + Ho * W * x_bytes       # f32 intermediate (+ cast copy)
               + Ho * Wo * 4)                        # f32 result before store
    fixed = 2 * (Ho * H + W * Wo) * w_bytes          # weight tiles
    cap = _vmem_capacity_bytes()
    budget = int(cap * 0.6)                          # ~38 MiB on v7x, ~76 MiB on v5e/v6e
    bc = _pick_block(nc, per_img, fixed, budget)

    grid = pl.cdiv(nc, bc)
    nc_pad = grid * bc
    if nc_pad != nc:                                 # pad instead of degrading to bc=1
        xf = jnp.pad(xf, ((0, nc_pad - nc), (0, 0), (0, 0)))

    vmem_limit = int(min(cap - (4 << 20),
                         max(fixed + bc * per_img + (8 << 20), 32 << 20)))

    out = pl.pallas_call(
        _interp_kernel,
        out_shape=jax.ShapeDtypeStruct((nc_pad, Ho, Wo), x.dtype),
        grid=(grid,),
        in_specs=[
            pl.BlockSpec((bc, H, W), lambda i: (i, 0, 0)),
            pl.BlockSpec((Ho, H), lambda i: (0, 0)),
            pl.BlockSpec((W, Wo), lambda i: (0, 0)),
        ],
        out_specs=pl.BlockSpec((bc, Ho, Wo), lambda i: (i, 0, 0)),
        compiler_params=pltpu.CompilerParams(
            dimension_semantics=("parallel",),
            vmem_limit_bytes=vmem_limit),
    )(xf, ah_j, bwt_j)

    if nc_pad != nc:
        out = out[:nc]
    return out.reshape(N, C, Ho, Wo)


class Interpolate:
    """Mirror of the PyTorch Interpolate module (forward only)."""

    def __init__(self, scale_factor, mode):
        self.scale_factor = scale_factor
        self.mode = mode

    def __call__(self, x):
        return interpolate_pallas(x, scale_factor=self.scale_factor, mode=self.mode)


if __name__ == "__main__":
    key = jax.random.PRNGKey(0)
    N, C, H, W = 2, 4, 16, 16
    x = jax.random.normal(key, (N, C, H, W), jnp.float32)

    interp = Interpolate(scale_factor=2, mode="bilinear")
    out = interp(x)
    jax.block_until_ready(out)

    assert out.shape == (N, C, 2 * H, 2 * W), out.shape
    assert out.dtype == x.dtype, out.dtype

    # jax.image.resize with half-pixel centers matches
    # F.interpolate(..., mode="bilinear", align_corners=False) for upsampling.
    ref = jax.image.resize(x, (N, C, 2 * H, 2 * W), method="bilinear")
    err = float(jnp.max(jnp.abs(out - ref)))
    assert err < 1e-4, err

    print("KERNEL_OK")
</pallas_src>

<mosaic_0001>
module attributes {stable_mosaic.version = 11 : i64} {
  func.func @_interp_kernel(%arg0: i32, %arg1: memref<4x16x16xf32, #tpu.memory_space<vmem>>, %arg2: memref<32x16xf32, #tpu.memory_space<vmem>>, %arg3: memref<16x32xf32, #tpu.memory_space<vmem>>, %arg4: memref<4x32x32xf32, #tpu.memory_space<vmem>>) attributes {dimension_semantics = [#tpu.dimension_semantics<parallel>], iteration_bounds = array<i64: 2>, scalar_prefetch = 0 : i64, scratch_operands = 0 : i64, tpu.core_type = #tpu.core_type<tc>, window_params = [{transform_indices = @transform_0, window_bounds = array<i64: 4, 16, 16>}, {pipeline_mode = #tpu.pipeline_mode<synchronous>, transform_indices = @transform_1, window_bounds = array<i64: 32, 16>}, {pipeline_mode = #tpu.pipeline_mode<synchronous>, transform_indices = @transform_2, window_bounds = array<i64: 16, 32>}, {transform_indices = @transform_3, window_bounds = array<i64: 4, 32, 32>}]} {
    %c0 = arith.constant 0 : index
    %c0_0 = arith.constant 0 : index
    %c0_1 = arith.constant 0 : index
    %0 = vector.load %arg1[%c0, %c0_0, %c0_1] : memref<4x16x16xf32, #tpu.memory_space<vmem>>, vector<4x16x16xf32>
    %c0_2 = arith.constant 0 : index
    %c0_3 = arith.constant 0 : index
    %1 = vector.load %arg2[%c0_2, %c0_3] : memref<32x16xf32, #tpu.memory_space<vmem>>, vector<32x16xf32>
    %c0_4 = arith.constant 0 : index
    %c0_5 = arith.constant 0 : index
    %2 = vector.load %arg3[%c0_4, %c0_5] : memref<16x32xf32, #tpu.memory_space<vmem>>, vector<16x32xf32>
    %3 = vector.shape_cast %1 : vector<32x16xf32> to vector<1x32x16xf32>
    %4 = vector.shape_cast %3 : vector<1x32x16xf32> to vector<1x32x16xf32>
    %5 = vector.broadcast %4 : vector<1x32x16xf32> to vector<4x32x16xf32>
    %cst = arith.constant dense<0.000000e+00> : vector<4x32x16xf32>
    %6 = tpu.matmul %5, %0, %cst {dimension_numbers = #tpu.dot_dimension_numbers<[2], [1], [1], [2], [0, 0, 0, 1, 1, 2], [0], [0]>} : vector<4x32x16xf32>, vector<4x16x16xf32>, vector<4x32x16xf32> -> vector<4x32x16xf32>
    %7 = vector.shape_cast %6 : vector<4x32x16xf32> to vector<128x16xf32>
    %cst_6 = arith.constant dense<0.000000e+00> : vector<128x32xf32>
    %8 = tpu.matmul %7, %2, %cst_6 {dimension_numbers = #tpu.dot_dimension_numbers<[1], [0], [0], [1], [0, 0, 1, 1], [], []>} : vector<128x16xf32>, vector<16x32xf32>, vector<128x32xf32> -> vector<128x32xf32>
    %9 = vector.shape_cast %8 : vector<128x32xf32> to vector<4x32x32xf32>
    %c0_7 = arith.constant 0 : index
    %c0_8 = arith.constant 0 : index
    %c0_9 = arith.constant 0 : index
    %10 = vector.load %arg4[%c0_7, %c0_8, %c0_9] : memref<4x32x32xf32, #tpu.memory_space<vmem>>, vector<4x32x32xf32>
    tpu.vector_store %arg4[%c0_7, %c0_8, %c0_9], %9 {strides = array<i32>} : memref<4x32x32xf32, #tpu.memory_space<vmem>>, vector<4x32x32xf32>,
    return
  }
  func.func @transform_0(%arg0: i32) -> (i32, i32, i32) {
    %c0_i32 = arith.constant 0 : i32
    %c0_i32_0 = arith.constant 0 : i32
    %c0_i32_1 = arith.constant 0 : i32
    return %arg0, %c0_i32, %c0_i32_0 : i32, i32, i32
  }
  func.func @transform_1(%arg0: i32) -> (i32, i32) {
    %c0_i32 = arith.constant 0 : i32
    %c0_i32_0 = arith.constant 0 : i32
    %c0_i32_1 = arith.constant 0 : i32
    return %c0_i32, %c0_i32_0 : i32, i32
  }
  func.func @transform_2(%arg0: i32) -> (i32, i32) {
    %c0_i32 = arith.constant 0 : i32
    %c0_i32_0 = arith.constant 0 : i32
    %c0_i32_1 = arith.constant 0 : i32
    return %c0_i32, %c0_i32_0 : i32, i32
  }
  func.func @transform_3(%arg0: i32) -> (i32, i32, i32) {
    %c0_i32 = arith.constant 0 : i32
    %c0_i32_0 = arith.constant 0 : i32
    %c0_i32_1 = arith.constant 0 : i32
    return %arg0, %c0_i32, %c0_i32_0 : i32, i32, i32
  }
}

</mosaic_0001>

<bundles_post_ra>
// kernel: interpolate_pallas.1
= control target key start
LH: loop header
LB: loop body
LE: loop exit
PB: predicated region body
PF: predicated region fallthrough
CT: control target
= control target key end

     0   :  { %8 = vsyncpa [#allocation3], 0  ;;  %s1661_s0 = inlined_call_operand.hbm [shape: f32[8,16,16], index: 0, kind: input, shape index: {}]   ;;  %s1662_s1 = inlined_call_operand.hbm [shape: f32[32,16], index: 1, kind: input, shape index: {}]   ;;  %s1663_s2 = inlined_call_operand.hbm [shape: f32[16,32], index: 2, kind: input, shape index: {}]   ;;  %s1664_s3 = inlined_call_operand.hbm [shape: f32[8,32,32], index: 3, kind: output, shape index: {}]  }
   0x1   :  { %10 = vsyncpa [#allocation3 + $0x1], 0 }
   0x2   :  { %11 = vsyncpa [#allocation6], 0 }
   0x3   :  { %12 = vsyncpa [#allocation4], 0 }
   0x4   :  { %14 = vsyncpa [#allocation4 + $0x1], 0  ;;  %s1350_s12 = smov 0   ;;  %s1352_s13 = smov 0  }
   0x5   :  { %s1354_s14 = smov 0   ;;  %s1356_s15 = smov 0  }
   0x6 LB: > { %s1371_s16 = sadd.s32 4294967295, %s1320_s15   ;;  %s905_s17 = sadd.s32 4294967294, %s1320_s15   ;;  %s1320_s15 = sphi %s1356_s15, %s1684_s15   ;;  %s1316_s14 = sphi %s1354_s14, %s1683_s14   ;;  %s1312_s13 = sphi %s1352_s13, %s1682_s13   ;;  %s1308_s12 = sphi %s1350_s12, %s1681_s12  }
   0x7   : > { %p40_p0 = scmp.ne.s32.totalorder %s1312_s13, %s1308_s12  ;;  %p1665_p1 = scmp.eq.s32.totalorder %s1371_s16, 0 }
   0x8   : > { %p112_p3 = scmp.eq.s32.totalorder %s905_s17, 1  ;;  %p906_p5 = scmp.ge.s32.totalorder %s1320_s15, 1 }
   0x9   : > { %p1380_p4 = por %p1665_p1, %p40_p0  ;;  %p119_p7 = scmp.lt.s32.totalorder %s1320_s15, 3 }
   0xa   : > { %p1385_p6 = por %p112_p3, %p40_p0  ;;  %s1322_s21 = smov [#allocation5]  }
   0xb   : > { %s1668_s18 = scalar_select %p1380_p4, 1, 0 }
   0xc   : > { %s1669_s19 = scalar_select %p1385_p6, 1, 0 }
   0xd   : > { %p1390_p8 = pnand %p906_p5, %p119_p7  ;;  %s131_s22 = sshll.u32 %s1322_s21, 4  ;;  %s1394_s22 = int_to_ptr.vmem [resolvable:$true] %s131_s22 }
   0xe   : > { %s1323_s24 = smov [#allocation7]   ;;  %s1164_s28 = scalar_lea.hbm %s1662_s1, 512 }
   0xf   : > { %p1105_p9 = pneg %p1390_p8  ;;  %s144_s25 = sshll.u32 %s1323_s24, 4  ;;  %s1405_s25 = int_to_ptr.vmem [resolvable:$true] %s144_s25 }
  0x10   : > { %p1165_p12 = scmp.ne.s32.totalorder %s1662_s1, %s1164_s28  ;;  %p1171_p5 = scmp.lt.u32.totalorder %s1164_s28, %s1662_s1 }
  0x11   : > { %p1401_p11 = pnand %p1105_p9, %p1665_p1 }
  0x13   : > { %p1166_p13 = pneg %p1401_p11 }
  0x15   : > { %p1167_p0 = pnand %p1166_p13, %p1165_p12 }
  0x17   : > { %p1168_p3 = pneg %p1167_p0 }
  0x19   : > { %p1173_p7 = pnand %p1171_p5, %p1168_p3 }
  0x1b   : > { %1176 = shalt.err (!%p1173_p7)
}
  0x1c   : > { %s1177_s6 = scalar_lea.vmem %s1394_s22, 512  ;;  %p1185_p2 = scmp.lt.s32.totalorder %s1394_s22, %s1394_s22 }
  0x1d   : > { %p1178_p9 = scmp.ne.s32.totalorder %s1394_s22, %s1177_s6  ;;  %p1186_p12 = scmp.lt.s32.totalorder %s1177_s6, %s1177_s6 }
  0x1f   : > { %p1180_p10 = pnand %p1178_p9, %p1166_p13  ;;  %p1187_p0 = por %p1186_p12, %p1185_p2 }
  0x21   : > { %p1181_p1 = pneg %p1180_p10 }
  0x23   : > { %p1188_p6 = pnand %p1187_p0, %p1181_p1 }
  0x25   : > { %1191 = shalt.err (!%p1188_p6)
}
  0x26   : > { %s1324_s7 = smov 128   ;;  %s1325_s8 = smov 8  }
  0x27   : > { %1108 = dma.hbm_to_vmem [thread:$0]  (!%p1401_p11), %s1662_s1, 512, %s1394_s22, [#allocation6], %s1324_s7, %s1324_s7, %s1325_s8  }
  0x28   : > { %s1192_s21 = scalar_lea.hbm %s1663_s2, 256 }
  0x29   : > { %p1193_p1 = scmp.ne.s32.totalorder %s1663_s2, %s1192_s21  ;;  %p1199_p10 = scmp.lt.u32.totalorder %s1192_s21, %s1663_s2 }
  0x2b   : > { %p1195_p2 = pnand %p1193_p1, %p1166_p13 }
  0x2d   : > { %p1196_p6 = pneg %p1195_p2 }
  0x2f   : > { %p1201_p3 = pnand %p1199_p10, %p1196_p6 }
  0x31   : > { %1204 = shalt.err (!%p1201_p3)
}
  0x32   : > { %s1205_s22 = scalar_lea.vmem %s1405_s25, 256  ;;  %p1213_p12 = scmp.lt.s32.totalorder %s1405_s25, %s1405_s25 }
  0x33   : > { %p1206_p5 = scmp.ne.s32.totalorder %s1405_s25, %s1205_s22  ;;  %p1214_p0 = scmp.lt.s32.totalorder %s1205_s22, %s1205_s22 }
  0x35   : > { %p1208_p7 = pnand %p1206_p5, %p1166_p13  ;;  %p1215_p1 = por %p1214_p0, %p1213_p12 }
  0x37   : > { %p1209_p9 = pneg %p1208_p7 }
  0x39   : > { %p1216_p2 = pnand %p1215_p1, %p1209_p9 }
  0x3b   : > { %1219 = shalt.err (!%p1216_p2)
}
  0x3c   : > { %1111 = dma.hbm_to_vmem [thread:$0]  (!%p1401_p11), %s1663_s2, 256, %s1405_s25, [#allocation6], %s1324_s7, %s1324_s7, %s1325_s8  }
  0x3d   : > { %s1466_s23 = sadd.s32 1, %s1320_s15   ;;  %s27_s4 = sadd.s32 1, %s1316_s14 }
  0x3e   : > { %s24_s5 = ssub.s32 %s1320_s15, %s1466_s23  ;;  %p34_p13 = scmp.ne.s32.totalorder %s1316_s14, %s1312_s13 }
  0x3f   : > { %p25_p6 = scmp.eq.s32.totalorder %s24_s5, 0  ;;  %p35_p10 = scmp.eq.s32.totalorder %s1320_s15, 0 }
  0x40   : > { %p1672_p3 = scmp.eq.s32.totalorder %s1371_s16, 1  ;;  %p1122_p7 = scmp.lt.s32.totalorder %s1320_s15, 2 }
  0x41   : > { %s1482_s9 = scalar_select %p25_p6, %s1316_s14, %s27_s4  }
  0x42   : > { %p1476_p5 = por %p1672_p3, %p34_p13  ;;  %p36_p9 = por %p35_p10, %p34_p13 }
  0x43   : > { %s158_s10 = sand.u32 1, %s1316_s14   ;;  %s958_s25 = sshll.u32 %s1320_s15, 10 }
  0x44   : > { %s1673_s6 = scalar_select %p1476_p5, 1, 0 }
  0x45   : > { %s910_s11 = sshll.u32 %s158_s10, 6  ;;  %s1489_s24 = scalar_lea.hbm %s1661_s0, %s958_s25 }
  0x46   : > { %s162_s26 = scalar_lea.vmem [#allocation2], %s910_s11  ;;  %p1493_p11 = pnand %p1122_p7, %p36_p9 }
  0x47   : > { %s170_s27 = sshll.u32 %s162_s26, 4  ;;  %s1497_s22 = scalar_lea.sflag [#allocation3], %s158_s10  ;;  %s1491_s27 = int_to_ptr.vmem [resolvable:$true] %s170_s27 }
  0x48   : > { %s1220_s29 = scalar_lea.hbm %s1489_s24, 1024  ;;  %p1222_p0 = pneg %p1493_p11 }
  0x49   : > { %p1221_p12 = scmp.ne.s32.totalorder %s1489_s24, %s1220_s29  ;;  %s1225_s5 = scalar_lea.hbm %s1661_s0, 2048 }
  0x4a   : > { %p1226_p13 = scmp.lt.u32.totalorder %s1489_s24, %s1661_s0  ;;  %p1227_p6 = scmp.lt.u32.totalorder %s1225_s5, %s1220_s29 }
  0x4b   : > { %p1223_p1 = pnand %p1222_p0, %p1221_p12  ;;  %p1229_p3 = scmp.lt.u32.totalorder %s1220_s29, %s1489_s24 }
  0x4c   : > { %p1228_p10 = por %p1227_p6, %p1226_p13 }
  0x4d   : > { %p1224_p2 = pneg %p1223_p1 }
  0x4e   : > { %p1230_p7 = por %p1229_p3, %p1228_p10 }
  0x50   : > { %p1231_p9 = pnand %p1230_p7, %p1224_p2 }
  0x52   : > { %1234 = shalt.err (!%p1231_p9)
}
  0x53   : > { %s1235_s10 = scalar_lea.vmem %s1491_s27, 1024  ;;  %s1326_s17 = smov [#allocation2]  }
  0x54   : > { %p1236_p12 = scmp.ne.s32.totalorder %s1491_s27, %s1235_s10  ;;  %s1240_s21 = sshll.u32 %s1326_s17, 4  ;;  %s1241_s21 = int_to_ptr.vmem [resolvable:$false] %s1240_s21 }
  0x55   : > { %s1242_s26 = scalar_lea.vmem %s1241_s21, 2048  ;;  %p1243_p4 = scmp.lt.s32.totalorder %s1491_s27, %s1241_s21 }
  0x56   : > { %p1238_p1 = pnand %p1236_p12, %p1222_p0  ;;  %p1244_p13 = scmp.lt.s32.totalorder %s1242_s26, %s1235_s10 }
  0x58   : > { %p1239_p5 = pneg %p1238_p1  ;;  %p1245_p6 = por %p1244_p13, %p1243_p4 }
  0x5a   : > { %p1246_p10 = pnand %p1245_p6, %p1239_p5 }
  0x5c   : > { %1249 = shalt.err (!%p1246_p10)
}
  0x5d   : > { %1115 = dma.hbm_to_vmem [thread:$0]  (!%p1493_p11), %s1489_s24, 1024, %s1491_s27, %s1497_s22, %s1324_s7, %s1324_s7, %s1325_s8  }
  0x5e   : > { %182 = sbr.rel (%p1390_p8) target bundleno = 574 (0x23e), region = 32  ;;  %s1531_s29 = sand.u32 (!%p1390_p8), 1, %s1312_s13  }
  0x5f   : > { %s915_s30 = sshll.u32 (!%p1390_p8), %s1531_s29, 6  ;;  %s185_s4 = scalar_lea.sflag (!%p1390_p8), [#allocation3], %s1531_s29 }
  0x60   : > { %s188_s5 = scalar_lea.vmem (!%p1390_p8), [#allocation2], %s915_s30  ;;  %p1675_p4 = scmp.ne.s32.totalorder (!%p1390_p8), %s1668_s18, 0 }
  0x65   : > { %1295 = dma.done.wait (%p1675_p4), %s185_s4, 1024  }
  0x66   : > { %1297 = vsyncadd (%p1675_p4), %s185_s4, 4294966272  ;;  %p1676_p5 = scmp.eq.s32.totalorder %s1371_s16, 0 }
  0x68   : > { %1299 = dma.done.wait (%p1676_p5), [#allocation6], 768   ;;  %p1677_p11 = pmov %p1676_p5 }
  0x69   : > { %vm235_vm0 = vcmask 130048   ;;  %v221_v0 = vld [vmem:[%s188_s5] sm:$0xff]  ;;  %v222_v1 = vld [vmem:[%s188_s5 + $0x8] sm:$0xff]  ;;  %v223_v7 = vld [vmem:[%s188_s5 + $0x10] sm:$0xff]  ;;  %s918_s18 = sshll.u32 %s1531_s29, 7  ;;  %vm781_vm1 = vcmask 261120  }
  0x6a   : > { %1301 = vsyncadd (%p1677_p11), [#allocation6], 4294966528  ;;  %v229_v2 = vld [vmem:[#allocation5] sm:$0xff]  ;;  %v1071_v3 = vpack.c.bf16 %v222_v1, %v221_v0  ;;  %v226_v5 = vld [vmem:[%s188_s5 + $0x28] sm:$0xff]  ;;  %s1576_s20 = scalar_lea.vmem [#allocation8], %s918_s18  ;;  %s960_s7 = sshll.u32 %s1371_s16, 11 }
  0x6b   : > { %1007 = vmatprep.mubr.msk.f32.mxu0 %vm235_vm0, %v229_v2  ;;  %v225_v4 = vld [vmem:[%s188_s5 + $0x20] sm:$0xff]  ;;  %1017 = vmatprep.mubr.msk.f32.mxu1 %vm235_vm0, %v229_v2  ;;  %v224_v8 = vld [vmem:[%s188_s5 + $0x18] sm:$0xff]  ;;  %v227_v9 = vld [vmem:[%s188_s5 + $0x30] sm:$0xff]  ;;  %s813_s8 = sshll.u32 %s1576_s20, 4  ;;  %s1611_s28 = scalar_lea.hbm %s1664_s3, %s960_s7  ;;  %s1613_s8 = int_to_ptr.vmem [resolvable:$true] %s813_s8 }
  0x6c   : > { %v1079_v6 = vpack.c.bf16 %v226_v5, %v225_v4  ;;  %1072 = vmatprep.subr.bf16.mxu0 %v1071_v3  ;;  %v228_v10 = vld [vmem:[%s188_s5 + $0x38] sm:$0xff]  ;;  %v230_v11 = vld [vmem:[#allocation5 + $0x8] sm:$0xff]  ;;  %v1075_v12 = vpack.c.bf16 %v224_v8, %v223_v7  ;;  %v233_v13 = vld [vmem:[#allocation7] sm:$0xff]  ;;  %s799_s16 = scalar_lea.sflag [#allocation4], %s1531_s29  ;;  %s1250_s22 = scalar_lea.vmem %s1613_s8, 2048 }
  0x6d   : > { %1074 = vmatpush3.bf16.msra.mxu0 %v1071_v3  ;;  %v234_v14 = vld [vmem:[#allocation7 + $0x8] sm:$0xff]  ;;  %v231_v15 = vld [vmem:[#allocation5 + $0x10] sm:$0xff]  ;;  %v1083_v16 = vpack.c.bf16 %v228_v10, %v227_v9  ;;  %v232_v18 = vld [vmem:[#allocation5 + $0x18] sm:$0xff]  ;;  %p1251_p8 = scmp.ne.s32.totalorder %s1613_s8, %s1250_s22  ;;  %p1678_p0 = scmp.ne.s32.totalorder %s1673_s6, 0 }
  0x6e   : > { %1080 = vmatprep.subr.bf16.mxu0 %v1079_v6  ;;  %v1087_v17 = vpack.c.bf16 %v234_v14, %v233_v13  ;;  %1076 = vmatprep.subr.bf16.mxu1 %v1075_v12  ;;  %s1327_s11 = smov [#allocation8]  }
  0x6f   : > { %1078 = vmatpush3.bf16.msra.mxu1 %v1075_v12  ;;  %p1252_p2 = pnand %p1251_p8, %p1678_p0  ;;  %s1254_s25 = sshll.u32 %s1327_s11, 4  ;;  %s1255_s25 = int_to_ptr.vmem [resolvable:$false] %s1254_s25 }
  0x70   : > { %1008 = vmatmul.mubr.msk.f32.vlgmr.msra.gmra.mrb[0].mxu0 %vm235_vm0, %v230_v11  ;;  %1084 = vmatprep.subr.bf16.mxu1 %v1083_v16  ;;  %s1256_s10 = scalar_lea.vmem %s1255_s25, 4096  ;;  %p1257_p7 = scmp.lt.s32.totalorder %s1613_s8, %s1255_s25 }
  0x71   : > { %1082 = vmatpush3.bf16.msra.mxu0 %v1079_v6  ;;  %1010 = vmatprep.mubr.msk.f32.mxu0 %vm235_vm0, %v231_v15  ;;  %p1253_p3 = pneg %p1252_p2  ;;  %p1258_p9 = scmp.lt.s32.totalorder %s1256_s10, %s1250_s22 }
  0x72   : > { %1088 = vmatprep.subr.bf16.mxu0 %v1087_v17  ;;  %1018 = vmatmul.mubr.msk.f32.vlgmr.msra.gmra.mrb[0].mxu1 %vm235_vm0, %v230_v11 }
  0x73   : > { %1086 = vmatpush3.bf16.msra.mxu1 %v1083_v16  ;;  %1020 = vmatprep.mubr.msk.f32.mxu1 %vm235_vm0, %v231_v15  ;;  %p1259_p12 = por %p1258_p9, %p1257_p7 }
  0x74   : > { %1011 = vmatmul.mubr.msk.f32.gmra.mrb[2].mxu0 %vm235_vm0, %v232_v18  ;;  %1091 = vmatprep.subr.bf16.mxu1 %v1087_v17 }
  0x75   : > { %1027 = vmatprep.mubr.msk.f32.mxu0 %vm235_vm0, %v229_v2  ;;  %p1260_p1 = pnand %p1259_p12, %p1253_p3 }
  0x76   : > { %1021 = vmatmul.mubr.msk.f32.gmra.mrb[2].mxu1 %vm235_vm0, %v232_v18 }
  0x77   : > { %1037 = vmatprep.mubr.msk.f32.mxu1 %vm235_vm0, %v229_v2 }
  0x78   : > { %1028 = vmatmul.mubr.msk.f32.vlgmr.msra.gmra.mrb[4].mxu0 %vm235_vm0, %v230_v11 }
  0x79   : > { %1030 = vmatprep.mubr.msk.f32.mxu0 %vm235_vm0, %v231_v15  ;;  %1090 = vmatpush3.bf16.msra.mxu0 %v1087_v17 }
  0x7a   : > { %1038 = vmatmul.mubr.msk.f32.vlgmr.msra.gmra.mrb[4].mxu1 %vm235_vm0, %v230_v11 }
  0x7b   : > { %1040 = vmatprep.mubr.msk.f32.mxu1 %vm235_vm0, %v231_v15  ;;  %1092 = vmatpush3.bf16.msra.mxu1 %v1087_v17 }
  0x7c   : > { %1031 = vmatmul.mubr.msk.f32.gmra.mrb[6].mxu0 %vm235_vm0, %v232_v18 }
  0x7e   : > { %1041 = vmatmul.mubr.msk.f32.gmra.mrb[6].mxu1 %vm235_vm0, %v232_v18 }
 0x143   : > { %v1009_v19 = vpop.f32.mrb[0].mxu0 }
 0x144   : > { %v314_v20 = vpop.f32.mrb[1].mxu0 }
 0x145   : > { %1047 = vmatprep.mubr.msk.f32.mxu0 %vm235_vm0, %v314_v20  ;;  %v1019_v21 = vpop.f32.mrb[0].mxu1 }
 0x146   : > { %1048 = vmatmul.mubr.msk.f32.vlgmr.msra.gmra.mrb[8].mxu0 %vm235_vm0, %v1009_v19  ;;  %v399_v23 = vpop.f32.mrb[1].mxu1 }
 0x147   : > { %v1012_v22 = vpop.f32.mrb[2].mxu0 }
 0x148   : > { %v324_v24 = vpop.f32.mrb[3].mxu0 }
 0x149   : > { %1050 = vmatprep.mubr.msk.f32.mxu0 %vm235_vm0, %v324_v24  ;;  %v1022_v25 = vpop.f32.mrb[2].mxu1 }
 0x14a   : > { %1051 = vmatmul.mubr.msk.f32.gmra.mrb[10].mxu0 %vm235_vm0, %v1012_v22  ;;  %v409_v27 = vpop.f32.mrb[3].mxu1 }
 0x14b   : > { %v1029_v26 = vpop.f32.mrb[4].mxu0  ;;  %1053 = vmatprep.mubr.msk.f32.mxu0 %vm235_vm0, %v399_v23 }
 0x14c   : > { %v484_v28 = vpop.f32.mrb[5].mxu0 }
 0x14d   : > { %1059 = vmatprep.mubr.msk.f32.mxu1 %vm235_vm0, %v484_v28  ;;  %v1039_v29 = vpop.f32.mrb[4].mxu1 }
 0x14e   : > { %1054 = vmatmul.mubr.msk.f32.gmra.mrb[12].mxu0 %vm235_vm0, %v1019_v21  ;;  %1060 = vmatmul.mubr.msk.f32.vlgmr.msra.gmra.mrb[8].mxu1 %vm235_vm0, %v1029_v26  ;;  %v569_v31 = vpop.f32.mrb[5].mxu1 }
 0x14f   : > { %v1032_v30 = vpop.f32.mrb[6].mxu0  ;;  %1056 = vmatprep.mubr.msk.f32.mxu0 %vm235_vm0, %v409_v27 }
 0x150   : > { %v494_v32 = vpop.f32.mrb[7].mxu0 }
 0x151   : > { %1062 = vmatprep.mubr.msk.f32.mxu1 %vm235_vm0, %v494_v32  ;;  %v1042_v33 = vpop.f32.mrb[6].mxu1 }
 0x152   : > { %1057 = vmatmul.mubr.msk.f32.gmra.mrb[14].mxu0 %vm235_vm0, %v1022_v25  ;;  %1063 = vmatmul.mubr.msk.f32.gmra.mrb[10].mxu1 %vm235_vm0, %v1032_v30  ;;  %v579_v34 = vpop.f32.mrb[7].mxu1 }
 0x153   : > { %1065 = vmatprep.mubr.msk.f32.mxu1 %vm235_vm0, %v569_v31 }
 0x156   : > { %1066 = vmatmul.mubr.msk.f32.gmra.mrb[12].mxu1 %vm235_vm0, %v1039_v29 }
 0x157   : > { %1068 = vmatprep.mubr.msk.f32.mxu1 %vm235_vm0, %v579_v34 }
 0x15a   : > { %1069 = vmatmul.mubr.msk.f32.gmra.mrb[14].mxu1 %vm235_vm0, %v1042_v33 }
 0x219   : > { %v1049_v35 = vpop.f32.mrb[8].mxu0 }
 0x21a   : > { %783 = vst.msk [vmem:[%s1576_s20 + $0x8] sm:$0xff] %vm781_vm1, %v1049_v35  ;;  %v702_v36 = vpop.f32.mrb[9].mxu0 }
 0x21b   : > { %782 = vst.msk [vmem:[%s1576_s20] sm:$0xff] %vm781_vm1, %v702_v36 }
 0x21d   : > { %v1052_v37 = vpop.f32.mrb[10].mxu0 }
 0x21e   : > { %785 = vst.msk [vmem:[%s1576_s20 + $0x18] sm:$0xff] %vm781_vm1, %v1052_v37  ;;  %v712_v38 = vpop.f32.mrb[11].mxu0 }
 0x21f   : > { %784 = vst.msk [vmem:[%s1576_s20 + $0x10] sm:$0xff] %vm781_vm1, %v712_v38 }
 0x221   : > { %v1055_v39 = vpop.f32.mrb[12].mxu0  ;;  %v1061_v40 = vpop.f32.mrb[8].mxu1 }
 0x222   : > { %787 = vst.msk [vmem:[%s1576_s20 + $0x28] sm:$0xff] %vm781_vm1, %v1055_v39  ;;  %791 = vst.msk [vmem:[%s1576_s20 + $0x48] sm:$0xff] %vm781_vm1, %v1061_v40  ;;  %v722_v41 = vpop.f32.mrb[13].mxu0  ;;  %v742_v42 = vpop.f32.mrb[9].mxu1 }
 0x223   : > { %786 = vst.msk [vmem:[%s1576_s20 + $0x20] sm:$0xff] %vm781_vm1, %v722_v41  ;;  %790 = vst.msk [vmem:[%s1576_s20 + $0x40] sm:$0xff] %vm781_vm1, %v742_v42 }
 0x225   : > { %v1058_v43 = vpop.f32.mrb[14].mxu0  ;;  %v1064_v44 = vpop.f32.mrb[10].mxu1 }
 0x226   : > { %789 = vst.msk [vmem:[%s1576_s20 + $0x38] sm:$0xff] %vm781_vm1, %v1058_v43  ;;  %793 = vst.msk [vmem:[%s1576_s20 + $0x58] sm:$0xff] %vm781_vm1, %v1064_v44  ;;  %v732_v45 = vpop.f32.mrb[15].mxu0  ;;  %v752_v46 = vpop.f32.mrb[11].mxu1 }
 0x227   : > { %788 = vst.msk [vmem:[%s1576_s20 + $0x30] sm:$0xff] %vm781_vm1, %v732_v45  ;;  %792 = vst.msk [vmem:[%s1576_s20 + $0x50] sm:$0xff] %vm781_vm1, %v752_v46 }
 0x229   : > { %v1067_v47 = vpop.f32.mrb[12].mxu1 }
 0x22a   : > { %795 = vst.msk [vmem:[%s1576_s20 + $0x68] sm:$0xff] %vm781_vm1, %v1067_v47  ;;  %v762_v48 = vpop.f32.mrb[13].mxu1 }
 0x22b   : > { %794 = vst.msk [vmem:[%s1576_s20 + $0x60] sm:$0xff] %vm781_vm1, %v762_v48 }
 0x22d   : > { %v1070_v49 = vpop.f32.mrb[14].mxu1 }
 0x22e   : > { %797 = vst.msk [vmem:[%s1576_s20 + $0x78] sm:$0xff] %vm781_vm1, %v1070_v49  ;;  %v772_v50 = vpop.f32.mrb[15].mxu1 }
 0x22f   : > { %796 = vst.msk [vmem:[%s1576_s20 + $0x70] sm:$0xff] %vm781_vm1, %v772_v50 }
 0x230   : > { %1263 = shalt.err (!%p1260_p1)
}
 0x231   : > { %s1264_s17 = scalar_lea.hbm %s1611_s28, 2048  ;;  %s1268_s30 = scalar_lea.hbm %s1664_s3, 4096 }
 0x232   : > { %p1265_p13 = scmp.ne.s32.totalorder %s1611_s28, %s1264_s17  ;;  %p1269_p4 = scmp.lt.u32.totalorder %s1611_s28, %s1664_s3 }
 0x233   : > { %p1270_p5 = scmp.lt.u32.totalorder %s1268_s30, %s1264_s17  ;;  %p1272_p8 = scmp.lt.u32.totalorder %s1264_s17, %s1611_s28 }
 0x234   : > { %p1266_p6 = pnand %p1265_p13, %p1678_p0 }
 0x235   : > { %p1271_p11 = por %p1270_p5, %p1269_p4 }
 0x236   : > { %p1267_p10 = pneg %p1266_p6 }
 0x237   : > { %p1273_p2 = por %p1272_p8, %p1271_p11 }
 0x239   : > { %p1274_p3 = pnand %p1273_p2, %p1267_p10 }
 0x23b   : > { %1277 = shalt.err (!%p1274_p3)
}
 0x23c   : > { %s1328_s18 = smov 128   ;;  %s1329_s20 = smov 8  }
 0x23d   : > { %1103 = dma.vmem_to_hbm [thread:$0]  (%p1678_p0), %s1613_s8, 2048, %s1611_s28, %s799_s16, %s1328_s18, %s1328_s18, %s1329_s20  }
 0x23e PF: > { %s828_s7 = sand.u32 1, %s1308_s12   ;;  %p1679_p7 = scmp.ne.s32.totalorder %s1669_s19, 0 }
 0x23f   : > { %p1680_p9 = scmp.ge.s32.totalorder %s1320_s15, 2  ;;  %s829_s24 = scalar_lea.sflag [#allocation4], %s828_s7 }
 0x241   : > { %p1117_p12 = pnand %p1680_p9, %p1679_p7 }
 0x243   : > { %1303 = dma.done.wait (!%p1117_p12), %s829_s24, 2048  }
 0x244   : > { %1305 = vsyncadd (!%p1117_p12), %s829_s24, 4294965248  ;;  %p17_p1 = scmp.ge.s32.totalorder %s1466_s23, 4   ;;  %s1681_s12 = smov %s1312_s13 }
 0x245   : > { %s1682_s13 = smov %s1316_s14  ;;  %s1683_s14 = smov %s1482_s9 }
 0x246   : > { %s1684_s15 = smov %s1466_s23  ;;  %19 = sbr.rel (!%p17_p1) target bundleno = 6 (0x6), region = 85 }
 0x24d   :  { %834 = vsyncpa [#allocation3], 1 }
 0x24e   :  { %836 = vsyncpa [#allocation3 + $0x1], 1 }
 0x24f   :  { %837 = vsyncpa [#allocation6], 1 }
 0x250   :  { %838 = vsyncpa [#allocation4], 1 }
 0x251   :  { %840 = vsyncpa [#allocation4 + $0x1], 1 }

</bundles_post_ra>
